<compile_context>
chip_gen: v5e
topology: v5e:2x2
jax: 0.10.0
libtpu: 0.0.40
codegen_flags: <defaults>
</compile_context>

<pallas_src>
import jax
import jax.numpy as jnp
from jax import lax
from jax.experimental import pallas as pl
from jax.experimental.pallas import tpu as pltpu

_CLAMP = 1e-4
_LANES = 128
_MAX_TILE_R = 1024


def _pick_tile_r(R, max_tile=_MAX_TILE_R):
    """Largest legal spatial tile (rows of 128 lanes) that evenly divides R."""
    if R <= max_tile:
        return R
    for tr in range(max_tile, 7, -1):
        if tr % 8 == 0 and R % tr == 0:
            return tr
    return R  # rare fallback: whole per-(b,c) row block (legal: equals full dim)


def _partial_reducer(tile_r):
    """Reduce a (tile_r, 128) tile to a lane-dense (PR, 128) partial using only
    vreg-aligned VPU adds (no per-step cross-lane reduction)."""
    if tile_r % 8 == 0:
        pr = 8

        def reduce_fn(x):
            return jnp.sum(x.reshape(tile_r // 8, 8, _LANES), axis=0)
    elif tile_r <= 8:
        pr = tile_r

        def reduce_fn(x):
            return x
    else:
        pr = 1

        def reduce_fn(x):
            return jnp.sum(x, axis=0, keepdims=True)
    return pr, reduce_fn


def _make_kernel(gamma, reduce_fn):
    if float(gamma) == int(gamma):
        g = int(gamma)
        pow_fn = lambda x: lax.integer_pow(x, g)  # gamma=2 -> single multiply
    else:
        pow_fn = lambda x: x ** gamma             # float gamma: true pow

    def kernel(alpha_ref, p_ref, t_ref, bce_ref, fw_ref, tsum_ref):
        c = pl.program_id(0)
        r = pl.program_id(2)

        @pl.when(r == 0)
        def _():
            bce_ref[...] = jnp.zeros_like(bce_ref)
            fw_ref[...] = jnp.zeros_like(fw_ref)
            tsum_ref[...] = jnp.zeros_like(tsum_ref)

        p = jnp.clip(p_ref[0, 0].astype(jnp.float32), _CLAMP, 1.0 - _CLAMP)
        t = t_ref[0, 0].astype(jnp.float32)
        alpha_c = alpha_ref[c]  # scalar read from SMEM

        is_pos = t == 1.0
        alpha_factor = jnp.where(is_pos, alpha_c, 1.0 - alpha_c)
        fw_base = jnp.where(is_pos, 1.0 - p, p)
        focal_weight = alpha_factor * pow_fn(fw_base)

        # F.binary_cross_entropy terms (mean taken later over all B*H*W elems).
        bce_terms = -(t * jnp.log(p) + (1.0 - t) * jnp.log(1.0 - p))
        masked_fw = jnp.where(t != -1.0, focal_weight, 0.0)

        bce_ref[0, 0] = bce_ref[0, 0] + reduce_fn(bce_terms)
        fw_ref[0, 0] = fw_ref[0, 0] + reduce_fn(masked_fw)
        tsum_ref[0, 0] = tsum_ref[0, 0] + reduce_fn(t)

    return kernel


def focal_loss_v1(predicts, targets, alpha, gamma=2, is_average=True):
    """Pallas port of FocalLossV1.forward. predicts/targets are NCHW."""
    predicts = predicts.astype(jnp.float32)
    # NOTE: targets with values in {-1, 0, 1} could be fed as bf16/int8 to cut
    # HBM traffic further (v5e win); kept f32 for exact parity with the module.
    targets = targets.astype(jnp.float32)
    B, C, H, W = predicts.shape
    HW = H * W
    assert HW % _LANES == 0, "H*W must be a multiple of 128 for this kernel"
    R = HW // _LANES
    tile_r = _pick_tile_r(R)
    num_r = R // tile_r
    pr, reduce_fn = _partial_reducer(tile_r)

    # Contiguous (free) reshapes -- no transpose, no extra HBM pass.
    p4 = predicts.reshape(B, C, R, _LANES)
    t4 = targets.reshape(B, C, R, _LANES)
    alpha = jnp.asarray(alpha, dtype=jnp.float32).reshape(C)

    kernel = _make_kernel(gamma, reduce_fn)

    part_shape = jax.ShapeDtypeStruct((C, B, pr, _LANES), jnp.float32)
    out_spec = pl.BlockSpec((1, 1, pr, _LANES), lambda c, b, r: (c, b, 0, 0))
    in_spec = pl.BlockSpec((1, 1, tile_r, _LANES), lambda c, b, r: (b, c, r, 0))

    bce_part, fw_part, t_part = pl.pallas_call(
        kernel,
        out_shape=(part_shape, part_shape, part_shape),
        grid=(C, B, num_r),
        in_specs=[
            # per-channel alpha scalars, resident in SMEM for the whole grid
            pl.BlockSpec(memory_space=pltpu.MemorySpace.SMEM),
            in_spec,
            in_spec,
        ],
        out_specs=(out_spec, out_spec, out_spec),
        compiler_params=pltpu.CompilerParams(
            dimension_semantics=("parallel", "parallel", "arbitrary")),
    )(alpha, p4, t4)

    # Tiny final combine outside the hot loop (one cross-lane reduce per sum).
    bce_sum = jnp.sum(bce_part, axis=(1, 2, 3))          # (C,)
    fw_sum = jnp.sum(fw_part, axis=(1, 2, 3))            # (C,)
    t_sum = jnp.sum(t_part, axis=(1, 2, 3))              # (C,)
    bce_mean = bce_sum / jnp.float32(B * HW)
    cls_loss = bce_mean * fw_sum / jnp.maximum(t_sum, 1.0)
    loss = jnp.sum(cls_loss) / jnp.float32(C)
    if not is_average:
        loss = loss * B
    return loss


def focal_loss_ref(predicts, targets, alpha, gamma=2, is_average=True):
    """Pure-JAX reference mirroring the PyTorch forward, for validation."""
    p = jnp.clip(predicts.astype(jnp.float32), _CLAMP, 1.0 - _CLAMP)
    t = targets.astype(jnp.float32)
    B, C = p.shape[0], p.shape[1]
    total = jnp.float32(0.0)
    for i in range(C):
        ti, pi = t[:, i], p[:, i]
        af = jnp.where(ti == 1.0, alpha[i], 1.0 - alpha[i])
        fw = jnp.where(ti == 1.0, 1.0 - pi, pi)
        fw = af * fw ** gamma
        bce = jnp.mean(-(ti * jnp.log(pi) + (1.0 - ti) * jnp.log(1.0 - pi)))
        cls = jnp.where(ti != -1.0, fw * bce, 0.0)
        cls = jnp.sum(cls) / jnp.maximum(jnp.sum(ti), 1.0)
        total = total + cls
    total = total / C
    return total if is_average else total * B


if __name__ == "__main__":
    key = jax.random.PRNGKey(0)
    k1, k2, k3 = jax.random.split(key, 3)

    B, C, H, W = 2, 4, 16, 16
    predicts = jax.random.uniform(k1, (B, C, H, W), dtype=jnp.float32)
    # binary targets with a few -1 "ignore" labels (module masks them out)
    targets = jax.random.randint(k2, (B, C, H, W), 0, 2).astype(jnp.float32)
    ignore = jax.random.uniform(k3, (B, C, H, W)) < 0.1
    targets = jnp.where(ignore, -1.0, targets)

    # deterministic per-channel alpha (module's __init__ takes `alpha` list)
    alpha = jnp.array([0.25, 0.5, 0.75, 0.9], dtype=jnp.float32)

    loss = focal_loss_v1(predicts, targets, alpha, gamma=2, is_average=True)
    loss = jax.block_until_ready(loss)

    ref = focal_loss_ref(predicts, targets, alpha, gamma=2, is_average=True)
    assert jnp.allclose(loss, ref, rtol=1e-4, atol=1e-6), (loss, ref)

    print("KERNEL_OK")
</pallas_src>

<mosaic_0001>
module attributes {stable_mosaic.version = 11 : i64} {
  func.func @kernel(%arg0: i32, %arg1: i32, %arg2: i32, %arg3: memref<4xf32, #tpu.memory_space<smem>>, %arg4: memref<1x1x2x128xf32, #tpu.memory_space<vmem>>, %arg5: memref<1x1x2x128xf32, #tpu.memory_space<vmem>>, %arg6: memref<1x1x2x128xf32, #tpu.memory_space<vmem>>, %arg7: memref<1x1x2x128xf32, #tpu.memory_space<vmem>>, %arg8: memref<1x1x2x128xf32, #tpu.memory_space<vmem>>) attributes {dimension_semantics = [#tpu.dimension_semantics<parallel>, #tpu.dimension_semantics<parallel>, #tpu.dimension_semantics<arbitrary>], iteration_bounds = array<i64: 4, 2, 1>, scalar_prefetch = 0 : i64, scratch_operands = 0 : i64, tpu.core_type = #tpu.core_type<tc>, window_params = [{transform_indices = @transform_0, window_bounds = array<i64: 4>}, {transform_indices = @transform_1, window_bounds = array<i64: 1, 1, 2, 128>}, {transform_indices = @transform_2, window_bounds = array<i64: 1, 1, 2, 128>}, {transform_indices = @transform_3, window_bounds = array<i64: 1, 1, 2, 128>}, {transform_indices = @transform_4, window_bounds = array<i64: 1, 1, 2, 128>}, {transform_indices = @transform_5, window_bounds = array<i64: 1, 1, 2, 128>}]} {
    %c0_i32 = arith.constant 0 : i32
    %0 = arith.cmpi eq, %arg2, %c0_i32 : i32
    %1 = arith.extui %0 : i1 to i32
    %c0_i32_0 = arith.constant 0 : i32
    %2 = arith.cmpi ne, %1, %c0_i32_0 : i32
    scf.if %2 {
      %cst_41 = arith.constant 0.000000e+00 : f32
      %57 = vector.broadcast %cst_41 : f32 to vector<1x1x2x128xf32>
      %c0_42 = arith.constant 0 : index
      %c0_43 = arith.constant 0 : index
      %c0_44 = arith.constant 0 : index
      %c0_45 = arith.constant 0 : index
      %58 = vector.load %arg6[%c0_42, %c0_43, %c0_44, %c0_45] : memref<1x1x2x128xf32, #tpu.memory_space<vmem>>, vector<1x1x2x128xf32>
      tpu.vector_store %arg6[%c0_42, %c0_43, %c0_44, %c0_45], %57 {strides = array<i32>} : memref<1x1x2x128xf32, #tpu.memory_space<vmem>>, vector<1x1x2x128xf32>,
      %cst_46 = arith.constant 0.000000e+00 : f32
      %59 = vector.broadcast %cst_46 : f32 to vector<1x1x2x128xf32>
      %c0_47 = arith.constant 0 : index
      %c0_48 = arith.constant 0 : index
      %c0_49 = arith.constant 0 : index
      %c0_50 = arith.constant 0 : index
      %60 = vector.load %arg7[%c0_47, %c0_48, %c0_49, %c0_50] : memref<1x1x2x128xf32, #tpu.memory_space<vmem>>, vector<1x1x2x128xf32>
      tpu.vector_store %arg7[%c0_47, %c0_48, %c0_49, %c0_50], %59 {strides = array<i32>} : memref<1x1x2x128xf32, #tpu.memory_space<vmem>>, vector<1x1x2x128xf32>,
      %cst_51 = arith.constant 0.000000e+00 : f32
      %61 = vector.broadcast %cst_51 : f32 to vector<1x1x2x128xf32>
      %c0_52 = arith.constant 0 : index
      %c0_53 = arith.constant 0 : index
      %c0_54 = arith.constant 0 : index
      %c0_55 = arith.constant 0 : index
      %62 = vector.load %arg8[%c0_52, %c0_53, %c0_54, %c0_55] : memref<1x1x2x128xf32, #tpu.memory_space<vmem>>, vector<1x1x2x128xf32>
      tpu.vector_store %arg8[%c0_52, %c0_53, %c0_54, %c0_55], %61 {strides = array<i32>} : memref<1x1x2x128xf32, #tpu.memory_space<vmem>>, vector<1x1x2x128xf32>,
    } else {
    }
    %c0 = arith.constant 0 : index
    %c0_1 = arith.constant 0 : index
    %c0_2 = arith.constant 0 : index
    %c0_3 = arith.constant 0 : index
    %3 = vector.load %arg4[%c0, %c0_1, %c0_2, %c0_3] : memref<1x1x2x128xf32, #tpu.memory_space<vmem>>, vector<1x1x2x128xf32>
    %4 = vector.shape_cast %3 : vector<1x1x2x128xf32> to vector<2x128xf32>
    %cst = arith.constant 9.99999974E-5 : f32
    %cst_4 = arith.constant 0.999899983 : f32
    %5 = vector.broadcast %cst : f32 to vector<2x128xf32>
    %6 = arith.maximumf %5, %4 : vector<2x128xf32>
    %7 = vector.broadcast %cst_4 : f32 to vector<2x128xf32>
    %8 = arith.minimumf %7, %6 : vector<2x128xf32>
    %c0_5 = arith.constant 0 : index
    %c0_6 = arith.constant 0 : index
    %c0_7 = arith.constant 0 : index
    %c0_8 = arith.constant 0 : index
    %9 = vector.load %arg5[%c0_5, %c0_6, %c0_7, %c0_8] : memref<1x1x2x128xf32, #tpu.memory_space<vmem>>, vector<1x1x2x128xf32>
    %10 = vector.shape_cast %9 : vector<1x1x2x128xf32> to vector<2x128xf32>
    %11 = arith.index_cast %arg0 : i32 to index
    %12 = memref.load %arg3[%11] : memref<4xf32, #tpu.memory_space<smem>>
    %cst_9 = arith.constant 1.000000e+00 : f32
    %13 = vector.broadcast %cst_9 : f32 to vector<2x128xf32>
    %14 = arith.cmpf oeq, %10, %13 : vector<2x128xf32>
    %cst_10 = arith.constant 1.000000e+00 : f32
    %15 = arith.subf %cst_10, %12 : f32
    %16 = vector.broadcast %12 : f32 to vector<2x128xf32>
    %17 = vector.broadcast %15 : f32 to vector<2x128xf32>
    %18 = arith.select %14, %16, %17 : vector<2x128xi1>, vector<2x128xf32>
    %cst_11 = arith.constant 1.000000e+00 : f32
    %19 = vector.broadcast %cst_11 : f32 to vector<2x128xf32>
    %20 = arith.subf %19, %8 : vector<2x128xf32>
    %21 = arith.select %14, %20, %8 : vector<2x128xi1>, vector<2x128xf32>
    %22 = arith.mulf %21, %21 : vector<2x128xf32>
    %23 = arith.mulf %18, %22 : vector<2x128xf32>
    %24 = math.log %8 : vector<2x128xf32>
    %25 = arith.mulf %10, %24 : vector<2x128xf32>
    %cst_12 = arith.constant 1.000000e+00 : f32
    %26 = vector.broadcast %cst_12 : f32 to vector<2x128xf32>
    %27 = arith.subf %26, %10 : vector<2x128xf32>
    %cst_13 = arith.constant 1.000000e+00 : f32
    %28 = vector.broadcast %cst_13 : f32 to vector<2x128xf32>
    %29 = arith.subf %28, %8 : vector<2x128xf32>
    %30 = math.log %29 : vector<2x128xf32>
    %31 = arith.mulf %27, %30 : vector<2x128xf32>
    %32 = arith.addf %25, %31 : vector<2x128xf32>
    %cst_14 = arith.constant 0.000000e+00 : f32
    %33 = vector.broadcast %cst_14 : f32 to vector<2x128xf32>
    %34 = arith.subf %33, %32 : vector<2x128xf32>
    %cst_15 = arith.constant -1.000000e+00 : f32
    %35 = vector.broadcast %cst_15 : f32 to vector<2x128xf32>
    %36 = arith.cmpf one, %10, %35 : vector<2x128xf32>
    %cst_16 = arith.constant 0.000000e+00 : f32
    %37 = vector.broadcast %cst_16 : f32 to vector<2x128xf32>
    %38 = arith.select %36, %23, %37 : vector<2x128xi1>, vector<2x128xf32>
    %c0_17 = arith.constant 0 : index
    %c0_18 = arith.constant 0 : index
    %c0_19 = arith.constant 0 : index
    %c0_20 = arith.constant 0 : index
    %39 = vector.load %arg6[%c0_17, %c0_18, %c0_19, %c0_20] : memref<1x1x2x128xf32, #tpu.memory_space<vmem>>, vector<1x1x2x128xf32>
    %40 = vector.shape_cast %39 : vector<1x1x2x128xf32> to vector<2x128xf32>
    %41 = arith.addf %40, %34 : vector<2x128xf32>
    %c0_21 = arith.constant 0 : index
    %c0_22 = arith.constant 0 : index
    %c0_23 = arith.constant 0 : index
    %c0_24 = arith.constant 0 : index
    %42 = vector.load %arg6[%c0_21, %c0_22, %c0_23, %c0_24] : memref<1x1x2x128xf32, #tpu.memory_space<vmem>>, vector<1x1x2x128xf32>
    %43 = vector.shape_cast %42 : vector<1x1x2x128xf32> to vector<2x128xf32>
    %44 = vector.shape_cast %41 : vector<2x128xf32> to vector<1x1x2x128xf32>
    tpu.vector_store %arg6[%c0_21, %c0_22, %c0_23, %c0_24], %44 {strides = array<i32>} : memref<1x1x2x128xf32, #tpu.memory_space<vmem>>, vector<1x1x2x128xf32>,
    %c0_25 = arith.constant 0 : index
    %c0_26 = arith.constant 0 : index
    %c0_27 = arith.constant 0 : index
    %c0_28 = arith.constant 0 : index
    %45 = vector.load %arg7[%c0_25, %c0_26, %c0_27, %c0_28] : memref<1x1x2x128xf32, #tpu.memory_space<vmem>>, vector<1x1x2x128xf32>
    %46 = vector.shape_cast %45 : vector<1x1x2x128xf32> to vector<2x128xf32>
    %47 = arith.addf %46, %38 : vector<2x128xf32>
    %c0_29 = arith.constant 0 : index
    %c0_30 = arith.constant 0 : index
    %c0_31 = arith.constant 0 : index
    %c0_32 = arith.constant 0 : index
    %48 = vector.load %arg7[%c0_29, %c0_30, %c0_31, %c0_32] : memref<1x1x2x128xf32, #tpu.memory_space<vmem>>, vector<1x1x2x128xf32>
    %49 = vector.shape_cast %48 : vector<1x1x2x128xf32> to vector<2x128xf32>
    %50 = vector.shape_cast %47 : vector<2x128xf32> to vector<1x1x2x128xf32>
    tpu.vector_store %arg7[%c0_29, %c0_30, %c0_31, %c0_32], %50 {strides = array<i32>} : memref<1x1x2x128xf32, #tpu.memory_space<vmem>>, vector<1x1x2x128xf32>,
    %c0_33 = arith.constant 0 : index
    %c0_34 = arith.constant 0 : index
    %c0_35 = arith.constant 0 : index
    %c0_36 = arith.constant 0 : index
    %51 = vector.load %arg8[%c0_33, %c0_34, %c0_35, %c0_36] : memref<1x1x2x128xf32, #tpu.memory_space<vmem>>, vector<1x1x2x128xf32>
    %52 = vector.shape_cast %51 : vector<1x1x2x128xf32> to vector<2x128xf32>
    %53 = arith.addf %52, %10 : vector<2x128xf32>
    %c0_37 = arith.constant 0 : index
    %c0_38 = arith.constant 0 : index
    %c0_39 = arith.constant 0 : index
    %c0_40 = arith.constant 0 : index
    %54 = vector.load %arg8[%c0_37, %c0_38, %c0_39, %c0_40] : memref<1x1x2x128xf32, #tpu.memory_space<vmem>>, vector<1x1x2x128xf32>
    %55 = vector.shape_cast %54 : vector<1x1x2x128xf32> to vector<2x128xf32>
    %56 = vector.shape_cast %53 : vector<2x128xf32> to vector<1x1x2x128xf32>
    tpu.vector_store %arg8[%c0_37, %c0_38, %c0_39, %c0_40], %56 {strides = array<i32>} : memref<1x1x2x128xf32, #tpu.memory_space<vmem>>, vector<1x1x2x128xf32>,
    return
  }
  func.func @transform_0(%arg0: i32, %arg1: i32, %arg2: i32) -> i32 {
    %c0_i32 = arith.constant 0 : i32
    %c0_i32_0 = arith.constant 0 : i32
    return %c0_i32 : i32
  }
  func.func @transform_1(%arg0: i32, %arg1: i32, %arg2: i32) -> (i32, i32, i32, i32) {
    %c0_i32 = arith.constant 0 : i32
    %c0_i32_0 = arith.constant 0 : i32
    return %arg1, %arg0, %arg2, %c0_i32 : i32, i32, i32, i32
  }
  func.func @transform_2(%arg0: i32, %arg1: i32, %arg2: i32) -> (i32, i32, i32, i32) {
    %c0_i32 = arith.constant 0 : i32
    %c0_i32_0 = arith.constant 0 : i32
    return %arg1, %arg0, %arg2, %c0_i32 : i32, i32, i32, i32
  }
  func.func @transform_3(%arg0: i32, %arg1: i32, %arg2: i32) -> (i32, i32, i32, i32) {
    %c0_i32 = arith.constant 0 : i32
    %c0_i32_0 = arith.constant 0 : i32
    %c0_i32_1 = arith.constant 0 : i32
    return %arg0, %arg1, %c0_i32, %c0_i32_0 : i32, i32, i32, i32
  }
  func.func @transform_4(%arg0: i32, %arg1: i32, %arg2: i32) -> (i32, i32, i32, i32) {
    %c0_i32 = arith.constant 0 : i32
    %c0_i32_0 = arith.constant 0 : i32
    %c0_i32_1 = arith.constant 0 : i32
    return %arg0, %arg1, %c0_i32, %c0_i32_0 : i32, i32, i32, i32
  }
  func.func @transform_5(%arg0: i32, %arg1: i32, %arg2: i32) -> (i32, i32, i32, i32) {
    %c0_i32 = arith.constant 0 : i32
    %c0_i32_0 = arith.constant 0 : i32
    %c0_i32_1 = arith.constant 0 : i32
    return %arg0, %arg1, %c0_i32, %c0_i32_0 : i32, i32, i32, i32
  }
}

</mosaic_0001>

<bundles_post_ra>
// kernel: tpu_custom_call.1
= control target key start
LH: loop header
LB: loop body
LE: loop exit
PB: predicated region body
PF: predicated region fallthrough
CT: control target
= control target key end

     0   :  { %s1310_s0 = inlined_call_operand.hbm [shape: f32[4], index: 0, kind: input, shape index: {}]   ;;  %s1311_s1 = inlined_call_operand.hbm [shape: f32[2,4,2,128], index: 1, kind: input, shape index: {}]   ;;  %s1312_s2 = inlined_call_operand.hbm [shape: f32[2,4,2,128], index: 2, kind: input, shape index: {}]   ;;  %s1313_s3 = inlined_call_operand.hbm [shape: f32[4,2,2,128], index: 3, kind: output, shape index: {0}]   ;;  %s1314_s4 = inlined_call_operand.hbm [shape: f32[4,2,2,128], index: 4, kind: output, shape index: {1}]   ;;  %s1315_s5 = inlined_call_operand.hbm [shape: f32[4,2,2,128], index: 5, kind: output, shape index: {2}]  }
   0x1   :  { %1325 = sst [smem:[#allocation23_spill]] %s1310_s0 }
   0x2   :  { %1326 = sst [smem:[#allocation24_spill]] %s1313_s3 }
   0x3   :  { %1327 = sst [smem:[#allocation25_spill]] %s1315_s5 }
   0x4   :  { %11 = vsyncpa [#allocation5], 0 }
   0x5   :  { %12 = vsyncpa [#allocation3], 0 }
   0x6   :  { %14 = vsyncpa [#allocation3 + $0x1], 0 }
   0x7   :  { %15 = vsyncpa [#allocation8], 0 }
   0x8   :  { %17 = vsyncpa [#allocation8 + $0x1], 0 }
   0x9   :  { %18 = vsyncpa [#allocation4], 0 }
   0xa   :  { %20 = vsyncpa [#allocation4 + $0x1], 0 }
   0xb   :  { %21 = vsyncpa [#allocation11], 0 }
   0xc   :  { %23 = vsyncpa [#allocation11 + $0x1], 0  ;;  %s1060_s18 = smov 0   ;;  %s1062_s19 = smov 0  }
   0xd   :  { %s1064_s20 = smov 0   ;;  %s1066_s21 = smov 0  }
   0xe   :  { %s1068_s22 = smov 0   ;;  %s1070_s23 = smov 0  }
   0xf   :  { %s1072_s24 = smov 0   ;;  %s1074_s25 = smov 0  }
  0x10 LB: > { %1328 = sst [smem:[#allocation18_spill]] %s998_s18  ;;  %s1101_s26 = sadd.s32 4294967295, %s1026_s25   ;;  %s1026_s25 = sphi %s1074_s25, %s29_s25   ;;  %s1022_s24 = sphi %s1072_s24, %s1353_s24   ;;  %s1018_s23 = sphi %s1070_s23, %s1352_s23   ;;  %s1014_s22 = sphi %s1068_s22, %s1351_s22   ;;  %s1010_s21 = sphi %s1066_s21, %s1350_s21   ;;  %s1006_s20 = sphi %s1064_s20, %s1349_s20   ;;  %s1002_s19 = sphi %s1062_s19, %s1348_s19   ;;  %s998_s18 = sphi %s1060_s18, %s1347_s18  }
  0x11   : > { %s1316_s27 = sadd.s32 4294967294, %s1026_s25   ;;  %p93_p0 = scmp.ne.s32.totalorder %s1002_s19, %s998_s18 }
  0x12   : > { %p94_p1 = scmp.eq.s32.totalorder %s1101_s26, 0  ;;  %p149_p2 = scmp.eq.s32.totalorder %s1101_s26, 7 }
  0x13   : > { %p155_p3 = scmp.eq.s32.totalorder %s1316_s27, 7  ;;  %p649_p5 = scmp.ge.s32.totalorder %s1026_s25, 1 }
  0x14   : > { %p1112_p4 = por %p94_p1, %p93_p0  ;;  %p218_p7 = scmp.lt.s32.totalorder %s1026_s25, 9 }
  0x15   : > { %p1117_p6 = por %p155_p3, %p93_p0  ;;  %s1332_s0 = sld [smem:[#allocation23_spill]] }
  0x16   : > { %p1125_p8 = pnand %p649_p5, %p218_p7  ;;  %s44_s9 = sadd.s32 1, %s1018_s23 }
  0x17   : > { %s1330_s29 = scalar_select %p1117_p6, 1, 0 }
  0x18   : > { %p690_p9 = pneg %p1125_p8  ;;  %s1028_s10 = smov [#allocation2]  }
  0x19   : > { %1331 = sst [smem:[#allocation19_spill]] %s1330_s29  ;;  %p46_p11 = scmp.ge.s32.totalorder %s44_s9, 2 }
  0x1a   : > { %p691_p10 = pnand %p690_p9, %p94_p1  ;;  %s48_s11 = sadd.s32 1, %s1022_s24 }
  0x1b   : > { %s230_s7 = sshll.u32 %s1332_s0, 4  ;;  %s80_s12 = sadd.s32 1, %s1006_s20  ;;  %s231_s7 = int_to_ptr.hbm [resolvable:$true] %s230_s7 }
  0x1c   : > { %693 = dma.hbm_to_smem (!%p691_p10), %s231_s7, 16, %s1028_s10, [#allocation5]  }
  0x1d   : > { %p87_p12 = scmp.ne.s32.totalorder %s1006_s20, %s1002_s19  ;;  %s1355_s9 = smov (%p46_p11, %s44_s9), 0 }
  0x1e   : > { %1334 = sst [smem:[#allocation20_spill]] %s1355_s9  ;;  %s1357_s11 = smov (!%p46_p11, %s48_s11), %s1022_s24 }
  0x1f   : > { %s73_s13 = ssub.s32 %s1018_s23, %s1355_s9  ;;  %p88_p13 = scmp.eq.s32.totalorder %s1026_s25, 0 }
  0x20   : > { %p50_p0 = scmp.ge.s32.totalorder %s1357_s11, 4  ;;  %p1146_p3 = por %p149_p2, %p87_p12 }
  0x21   : > { %p1150_p5 = por %p88_p13, %p87_p12  ;;  %p712_p7 = scmp.lt.s32.totalorder %s1026_s25, 8 }
  0x22   : > { %s1335_s14 = scalar_select %p1146_p3, 1, 0 }
  0x23   : > { %s1359_s11 = smov (%p50_p0, %s1357_s11), 0  ;;  %s241_s16 = sand.u32 1, %s1006_s20  }
  0x24   : > { %1336 = sst [smem:[#allocation21_spill]] %s1335_s14  ;;  %s653_s17 = sshll.u32 %s1018_s23, 2 }
  0x25   : > { %1338 = sst [smem:[#allocation22_spill]] %s1359_s11  ;;  %s74_s30 = ssub.s32 %s1022_s24, %s1359_s11 }
  0x26   : > { %s75_s6 = sor.u32 %s74_s30, %s73_s13  ;;  %s652_s7 = sshll.u32 %s241_s16, 1 }
  0x27   : > { %p78_p9 = scmp.eq.s32.totalorder %s75_s6, 0  ;;  %s250_s10 = sadd.s32 %s1022_s24, %s653_s17 }
  0x28   : > { %s245_s27 = scalar_lea.vmem [#allocation6], %s652_s7  ;;  %s654_s29 = sshll.u32 %s250_s10, 1 }
  0x29   : > { %s256_s0 = sshll.u32 %s245_s27, 4  ;;  %s252_s3 = scalar_lea.hbm %s1311_s1, %s654_s29  ;;  %s257_s0 = int_to_ptr.vmem [resolvable:$true] %s256_s0 }
  0x2a   : > { %s1163_s9 = scalar_select %p78_p9, %s1006_s20, %s80_s12  }
  0x2b   : > { %p695_p2 = pnand %p712_p7, %p1150_p5  ;;  %s254_s5 = sshll.u32 %s252_s3, 4  ;;  %s255_s5 = int_to_ptr.hbm [resolvable:$true] %s254_s5 }
  0x2c   : > { %s242_s11 = scalar_lea.sflag [#allocation3], %s241_s16  ;;  %s274_s17 = scalar_lea.hbm %s1312_s2, %s654_s29 }
  0x2d   : > { %697 = dma.hbm_to_vmem [thread:$0]  (!%p695_p2), %s255_s5, 32, %s257_s0, %s242_s11  }
  0x2e   : > { %s276_s27 = sshll.u32 %s274_s17, 4  ;;  %s267_s12 = scalar_lea.vmem [#allocation7], %s652_s7  ;;  %s277_s27 = int_to_ptr.hbm [resolvable:$true] %s276_s27 }
  0x2f   : > { %s278_s6 = sshll.u32 %s267_s12, 4  ;;  %s264_s10 = scalar_lea.sflag [#allocation8], %s241_s16  ;;  %s279_s6 = int_to_ptr.vmem [resolvable:$true] %s278_s6 }
  0x30   : > { %700 = dma.hbm_to_vmem [thread:$0]  (!%p695_p2), %s277_s27, 32, %s279_s6, %s264_s10  }
  0x31   : > { %287 = sbr.rel (%p1125_p8) target bundleno = 108 (0x6c), region = 32 }
  0x36   : > { %977 = dma.done.wait (%p94_p1), [#allocation5], 16  }
  0x37   : > { %979 = vsyncadd (%p94_p1), [#allocation5], 4294967280  ;;  %s1182_s0 = sand.u32 1, %s1002_s19  }
  0x38   : > { %s660_s3 = sshll.u32 %s1182_s0, 1  ;;  %s295_s5 = scalar_lea.sflag [#allocation3], %s1182_s0 }
  0x39   : > { %s298_s18 = scalar_lea.vmem [#allocation6], %s660_s3 }
  0x3a   : > { %981 = dma.done.wait (%p1112_p4), %s295_s5, 32  }
  0x3b   : > { %983 = vsyncadd (%p1112_p4), %s295_s5, 4294967264  ;;  %s305_s29 = scalar_lea.sflag [#allocation8], %s1182_s0  ;;  %s308_s8 = scalar_lea.vmem [#allocation7], %s660_s3 }
  0x3c   : > { %985 = dma.done.wait (%p1112_p4), %s305_s29, 32  }
  0x3d   : > { %987 = vsyncadd (%p1112_p4), %s305_s29, 4294967264 }
  0x3e   : > { %314 = sfence }
  0x3f   : > { %v359_v0 = vld [vmem:[%s298_s18] sm:$0x3]  ;;  %s1195_s11 = scalar_lea.vmem [#allocation10], %s660_s3  ;;  %v1029_v1 = vmov 0.0   ;;  %v362_v3 = vld [vmem:[%s308_s8] sm:$0x3] }
  0x40   : > { %357 = vst [vmem:[%s1195_s11] sm:$0x3] %v1029_v1  ;;  %v360_v2 = vmax.f32 %v359_v0, 0.0001  ;;  %s1198_s14 = scalar_lea.vmem [#allocation9], %s660_s3  ;;  %s363_s15 = sld [smem:[#allocation2 + %s1014_s22]]  ;;  %vm364_vm0 = vcmp.eq.f32.partialorder %v362_v3, 1.0 }
  0x41   : > { %356 = vst [vmem:[%s1198_s14] sm:$0x3] %v1029_v1  ;;  %s1202_s16 = scalar_lea.vmem [#allocation12], %s660_s3  ;;  %s668_s28 = sshll.u32 %s1014_s22, 1  ;;  %vm382_vm1 = vcmp.ne.f32.partialorder %v362_v3, -1.0  ;;  %v376_v13 = vsub.f32 1.0, %v362_v3 }
  0x42   : > { %358 = vst [vmem:[%s1202_s16] sm:$0x3] %v1029_v1  ;;  %v361_v4 = vmin.f32 %v360_v2, 0.9999  ;;  %s414_s7 = sadd.s32 %s1010_s21, %s668_s28  ;;  %s398_s21 = sand.u32 1, %s1101_s26  }
  0x43   : > { %s1207_s13 = sshll.u32 %s414_s7, 1  ;;  %s1339_s10 = sld [smem:[#allocation25_spill]] }
  0x44   : > { %v369_v5 = vsub.f32 1.0, %v361_v4  ;;  %781 = vlog2.f32 %v361_v4  ;;  %s432_s22 = scalar_lea.hbm %s1314_s4, %s1207_s13  ;;  %s434_s5 = sshll.u32 %s1195_s11, 4  ;;  %s435_s5 = int_to_ptr.vmem [resolvable:$true] %s434_s5 }
  0x45   : > { %s1221_s18 = sshll.u32 %s432_s22, 4  ;;  %s450_s29 = sshll.u32 %s1202_s16, 4  ;;  %s437_s18 = int_to_ptr.hbm [resolvable:$true] %s1221_s18  ;;  %s1232_s29 = int_to_ptr.vmem [resolvable:$true] %s450_s29 }
  0x46   : > { %v370_v6 = vsel %vm364_vm0, %v369_v5, %v361_v4  ;;  %783 = vlog2.f32 %v369_v5  ;;  %s365_s30 = ssub.f32 1.0, %s363_s15  ;;  %v366_v7 = vstv %s363_s15  ;;  %s399_s27 = scalar_lea.sflag [#allocation11], %s398_s21 }
  0x47   : > { %v371_v8 = vmul.f32 %v370_v6, %v370_v6  ;;  %v387_v16 = vld [vmem:[%s1195_s11] sm:$0x3]  ;;  %s1340_s28 = sld [smem:[#allocation24_spill]]  ;;  %s874_s22 = sshra.s32 %s437_s18, 4  ;;  %s875_s22 = int_to_ptr.hbm [resolvable:$true] %s874_s22 }
  0x48   : > { %v367_v9 = vstv %s365_s30  ;;  %s876_s12 = scalar_lea.hbm %s875_s22, 2  ;;  %p881_p10 = scmp.lt.s32.totalorder %s875_s22, %s1314_s4 }
  0x49   : > { %v390_v10 = vld [vmem:[%s1202_s16] sm:$0x3]  ;;  %v368_v12 = vsel %vm364_vm0, %v366_v7, %v367_v9  ;;  %s448_s3 = scalar_lea.hbm %s1339_s10, %s1207_s13  ;;  %p877_p1 = scmp.ne.s32.totalorder %s875_s22, %s876_s12 }
  0x4a   : > { %v782_v11 = vpop.eup %781  ;;  %v391_v14 = vadd.f32 %v390_v10, %v362_v3  ;;  %v372_v15 = vmul.f32 %v371_v8, %v368_v12  ;;  %s1225_s8 = sshll.u32 %s448_s3, 4  ;;  %s880_s3 = scalar_lea.hbm %s1314_s4, 16  ;;  %s453_s8 = int_to_ptr.hbm [resolvable:$true] %s1225_s8 }
  0x4b   : > { %v374_v17 = vmul.f32 0.6931472, %v782_v11  ;;  %p878_p4 = pnand %p877_p1, %p1146_p3  ;;  %p882_p11 = scmp.lt.s32.totalorder %s880_s3, %s876_s12 }
  0x4c   : > { %v784_v18 = vpop.eup %783  ;;  %392 = vst [vmem:[%s1202_s16] sm:$0x3] %v391_v14  ;;  %v383_v19 = vsel %vm382_vm1, %v372_v15, 0.0  ;;  %s418_s16 = sshll.u32 %s1198_s14, 4  ;;  %s419_s16 = int_to_ptr.vmem [resolvable:$true] %s418_s16 }
  0x4d   : > { %v375_v20 = vmul.f32 %v374_v17, %v362_v3  ;;  %v378_v21 = vmul.f32 0.6931472, %v784_v18  ;;  %s416_s7 = scalar_lea.hbm %s1340_s28, %s1207_s13  ;;  %v388_v22 = vadd.f32 %v387_v16, %v383_v19  ;;  %p879_p8 = pneg %p878_p4 }
  0x4e   : > { %s1237_s17 = sshll.u32 %s416_s7, 4  ;;  %p883_p12 = por %p882_p11, %p881_p10  ;;  %s421_s17 = int_to_ptr.hbm [resolvable:$true] %s1237_s17 }
  0x4f   : > { %v379_v23 = vmul.f32 %v378_v21, %v376_v13  ;;  %389 = vst [vmem:[%s1195_s11] sm:$0x3] %v388_v22 }
  0x50   : > { %p884_p13 = pnand %p883_p12, %p879_p8 }
  0x51   : > { %v380_v24 = vadd.f32 %v379_v23, %v375_v20 }
  0x52   : > { %887 = shalt.err (!%p884_p13)
}
  0x53   : > { %685 = dma.vmem_to_hbm [thread:$0]  (%p1146_p3), %s435_s5, 32, %s437_s18, %s399_s27   ;;  %v384_v25 = vld [vmem:[%s1198_s14] sm:$0x3] }
  0x54   : > { %s902_s11 = sshra.s32 %s453_s8, 4  ;;  %s908_s12 = scalar_lea.hbm %s1339_s10, 16  ;;  %s903_s11 = int_to_ptr.hbm [resolvable:$true] %s902_s11 }
  0x55   : > { %s904_s21 = scalar_lea.hbm %s903_s11, 2  ;;  %p909_p9 = scmp.lt.s32.totalorder %s903_s11, %s1339_s10 }
  0x56   : > { %p905_p0 = scmp.ne.s32.totalorder %s903_s11, %s904_s21  ;;  %p910_p2 = scmp.lt.s32.totalorder %s908_s12, %s904_s21 }
  0x58   : > { %p906_p5 = pnand %p905_p0, %p1146_p3  ;;  %p911_p1 = por %p910_p2, %p909_p9 }
  0x5a   : > { %p907_p7 = pneg %p906_p5 }
  0x5c   : > { %p912_p4 = pnand %p911_p1, %p907_p7 }
  0x5e   : > { %915 = shalt.err (!%p912_p4)
}
  0x5f   : > { %686 = dma.vmem_to_hbm [thread:$0]  (%p1146_p3), %s1232_s29, 32, %s453_s8, %s399_s27   ;;  %v381_v26 = vsub.f32 0.0, %v380_v24 }
  0x60   : > { %s394_s5 = scalar_lea.sflag [#allocation4], %s1182_s0  ;;  %s930_s18 = sshra.s32 %s421_s17, 4  ;;  %s931_s18 = int_to_ptr.hbm [resolvable:$true] %s930_s18 }
  0x61   : > { %v385_v27 = vadd.f32 %v384_v25, %v381_v26  ;;  %s932_s3 = scalar_lea.hbm %s931_s18, 2  ;;  %s936_s11 = scalar_lea.hbm %s1340_s28, 16 }
  0x62   : > { %p933_p8 = scmp.ne.s32.totalorder %s931_s18, %s932_s3  ;;  %p937_p12 = scmp.lt.s32.totalorder %s931_s18, %s1340_s28 }
  0x63   : > { %386 = vst [vmem:[%s1198_s14] sm:$0x3] %v385_v27  ;;  %p938_p13 = scmp.lt.s32.totalorder %s936_s11, %s932_s3 }
  0x64   : > { %p934_p10 = pnand %p933_p8, %p1146_p3 }
  0x65   : > { %p939_p0 = por %p938_p13, %p937_p12 }
  0x66   : > { %p935_p11 = pneg %p934_p10 }
  0x68   : > { %p940_p5 = pnand %p939_p0, %p935_p11 }
  0x6a   : > { %943 = shalt.err (!%p940_p5)
}
  0x6b   : > { %684 = dma.vmem_to_hbm [thread:$0]  (%p1146_p3), %s419_s16, 32, %s421_s17, %s394_s5  }
  0x6c PF: > { %s1342_s0 = sld [smem:[#allocation18_spill]]  ;;  %p714_p7 = scmp.ge.s32.totalorder %s1026_s25, 2 }
  0x6e   : > { %p702_p9 = pnand %p714_p7, %p1117_p6 }
  0x70   : > { %p703_p2 = pneg %p702_p9 }
  0x72   : > { %s464_s8 = sand.u32 1, %s1342_s0  }
  0x73   : > { %s465_s27 = scalar_lea.sflag [#allocation4], %s464_s8 }
  0x74   : > { %989 = dma.done.wait (%p703_p2), %s465_s27, 32  }
  0x75   : > { %991 = vsyncadd (%p703_p2), %s465_s27, 4294967264  ;;  %s1344_s7 = sadd.s32 4294967294, %s1026_s25  }
  0x76   : > { %s474_s22 = sand.u32 1, %s1344_s7  }
  0x77   : > { %s475_s12 = scalar_lea.sflag [#allocation11], %s474_s22 }
  0x78   : > { %993 = dma.done.wait (%p703_p2), %s475_s12, 64  }
  0x79   : > { %995 = vsyncadd (%p703_p2), %s475_s12, 4294967232  ;;  %s29_s25 = sadd.s32 1, %s1026_s25   ;;  %s1345_s30 = sld [smem:[#allocation20_spill]] }
  0x7a   : > { %p26_p3 = scmp.ge.s32.totalorder %s29_s25, 10   ;;  %s1346_s16 = sld [smem:[#allocation22_spill]] }
  0x7b   : > { %s1347_s18 = smov %s1002_s19  ;;  %s1348_s19 = smov %s1006_s20 }
  0x7c   : > { %s1349_s20 = smov %s1163_s9  ;;  %s1350_s21 = smov %s1018_s23 }
  0x7d   : > { %s1351_s22 = smov %s1022_s24  ;;  %28 = sbr.rel (!%p26_p3) target bundleno = 16 (0x10), region = 131 }
  0x7f   : > { %s1352_s23 = smov %s1345_s30 }
  0x80   : > { %s1353_s24 = smov %s1346_s16 }
  0x82   :  { %491 = vsyncpa [#allocation3], 1 }
  0x83   :  { %493 = vsyncpa [#allocation3 + $0x1], 1 }
  0x84   :  { %494 = vsyncpa [#allocation8], 1 }
  0x85   :  { %496 = vsyncpa [#allocation8 + $0x1], 1 }
  0x86   :  { %497 = vsyncpa [#allocation4], 1 }
  0x87   :  { %499 = vsyncpa [#allocation4 + $0x1], 1 }
  0x88   :  { %500 = vsyncpa [#allocation11], 1 }
  0x89   :  { %502 = vsyncpa [#allocation11 + $0x1], 1 }
  0x8a   :  { %503 = vsyncpa [#allocation5], 1 }
  0x8b   :  { %505 = vsyncpa [#allocation5 + $0x1], 1 }

</bundles_post_ra>
